<compile_context>
chip_gen: v7x
topology: tpu7x:2x2x1
jax: 0.10.0
libtpu: 0.0.40
codegen_flags: <defaults>
</compile_context>

<pallas_src>
import functools

import jax
import jax.numpy as jnp
from jax.experimental import pallas as pl
from jax.experimental.pallas import tpu as pltpu

_SUBLANE = 8
_LANE = 128
_MAX_ROW_TILE = 2048
_PER_BUFFER_BYTES = 4 * 1024 * 1024      # x-block + mask-block per pipeline buffer
_VMEM_LIMIT_BYTES = 32 * 1024 * 1024     # raises v5e's 16 MiB default; == v6e/v7x default


def _ceil_div(a, b):
    return -(-a // b)


def _round_up(a, b):
    return _ceil_div(a, b) * b


def _min_sentinel(dtype):
    """masked_fill value: -inf for floats, iinfo.min for integers."""
    dtype = jnp.dtype(dtype)
    if jnp.issubdtype(dtype, jnp.floating):
        return float("-inf")
    if jnp.issubdtype(dtype, jnp.integer):
        return int(jnp.iinfo(dtype).min)
    raise TypeError(f"MaxPooling: unsupported input dtype {dtype}")


def _choose_row_tile(n_rows, bytes_per_row):
    """Rows per grid step.

    Sized so two pipeline buffers of (x block + mask block) stay well inside
    the default scoped VMEM of every generation (16 MiB v5e, 32 MiB v6e/v7x,
    64 MiB physical on v7x) while each step still moves megabyte-scale data.
    """
    tile = _PER_BUFFER_BYTES // max(1, bytes_per_row)
    tile = max(_SUBLANE, min(tile, _MAX_ROW_TILE))
    tile = (tile // _SUBLANE) * _SUBLANE
    if tile >= n_rows:
        if n_rows > 2 * _SUBLANE:
            # Whole problem fits in one block: split into ~2 blocks so a
            # two-TensorCore chip (v7x) still shards the "parallel" grid.
            tile = _round_up(_ceil_div(n_rows, 2), _SUBLANE)
        else:
            tile = _round_up(n_rows, _SUBLANE)
    if tile >= _LANE:
        tile = (tile // _LANE) * _LANE   # nicer DMA/layout alignment for big tiles
    return tile


def _max_kernel(x_ref, o_ref):
    # x_ref: (tile, S) block; reduce over the lane axis.
    o_ref[...] = jnp.max(x_ref[...], axis=-1, keepdims=True)


def _masked_max_kernel(x_ref, m_ref, o_ref, *, sentinel):
    # masked_fill(mask == 0, sentinel) then max over the lane axis.
    x = x_ref[...]
    filled = jnp.where(m_ref[...] == 0, jnp.asarray(sentinel, dtype=x.dtype), x)
    o_ref[...] = jnp.max(filled, axis=-1, keepdims=True)


def _pooled_rows(x2, m2):
    """(Masked) row-max of a (R, S) view. Returns shape (R,)."""
    R, S = x2.shape
    bytes_per_row = S * jnp.dtype(x2.dtype).itemsize
    if m2 is not None:
        bytes_per_row += S * jnp.dtype(m2.dtype).itemsize
    tile = _choose_row_tile(R, bytes_per_row)
    n_blocks = _ceil_div(R, tile)

    in_specs = [pl.BlockSpec((tile, S), lambda i: (i, 0))]
    args = [x2]
    if m2 is None:
        kernel = _max_kernel
    else:
        in_specs.append(pl.BlockSpec((tile, S), lambda i: (i, 0)))
        args.append(m2)
        kernel = functools.partial(_masked_max_kernel,
                                   sentinel=_min_sentinel(x2.dtype))

    out = pl.pallas_call(
        kernel,
        out_shape=jax.ShapeDtypeStruct((R, 1), x2.dtype),
        grid=(n_blocks,),
        in_specs=in_specs,
        out_specs=pl.BlockSpec((tile, 1), lambda i: (i, 0)),
        compiler_params=pltpu.CompilerParams(
            dimension_semantics=("parallel",),
            vmem_limit_bytes=_VMEM_LIMIT_BYTES),
    )(*args)
    # Tail block (when tile doesn't divide R) reads/writes clamped garbage
    # rows; they never land inside the first R output rows.
    return out[:, 0]


class MaxPooling:
    """JAX/Pallas port of the PyTorch MaxPooling module (mask-aware max)."""

    def __init__(self, dim=-1, keep_dim=False):
        self.dim = dim
        self.keep_dim = keep_dim

    def __call__(self, x, mask=None):
        x = jnp.asarray(x)
        ndim = x.ndim
        dim = self.dim % ndim
        # Move the pooled axis last (free when it already is last).
        xt = x if dim == ndim - 1 else jnp.moveaxis(x, dim, -1)
        lead, S = xt.shape[:-1], xt.shape[-1]
        R = 1
        for d in lead:
            R *= d

        mt = None
        if mask is not None:
            m = jnp.asarray(mask)
            if m.ndim < ndim:                      # right-aligned broadcast, like torch
                m = m.reshape((1,) * (ndim - m.ndim) + m.shape)
            m = m if dim == ndim - 1 else jnp.moveaxis(m, dim, -1)
            if m.dtype == jnp.bool_:
                m = m.astype(jnp.int8)
            if m.shape != xt.shape:
                # Generic broadcast fallback, materialised at 1 byte/element so
                # the extra HBM traffic stays small (vs. the old int32 path).
                m = jnp.broadcast_to(m.astype(jnp.int8), xt.shape)
            mt = m

        x2 = xt.reshape(R, S)
        m2 = mt.reshape(R, S) if mt is not None else None
        pooled = _pooled_rows(x2, m2)
        out = pooled.reshape(lead)
        if self.keep_dim:
            out = jnp.expand_dims(out, dim)
        return out


def _reference(x, mask, dim, keep_dim):
    if mask is None:
        return jnp.max(x, axis=dim, keepdims=keep_dim)
    m = jnp.asarray(mask)
    if m.ndim < x.ndim:
        m = m.reshape((1,) * (x.ndim - m.ndim) + m.shape)
    m = jnp.broadcast_to(m, x.shape)
    sentinel = jnp.asarray(_min_sentinel(x.dtype), x.dtype)
    return jnp.max(jnp.where(m == 0, sentinel, x), axis=dim, keepdims=keep_dim)


if __name__ == "__main__":
    key = jax.random.PRNGKey(0)
    k1, k2, k3, k4 = jax.random.split(key, 4)

    # 1) Canonical case: x (B, H, S), full-shape mask, pool over the last axis.
    B, H, S = 2, 4, 128
    x = jax.random.normal(k1, (B, H, S), dtype=jnp.float32)
    mask = (jax.random.uniform(k2, (B, H, S)) > 0.3).astype(jnp.int32)
    mask = mask.at[..., 0].set(1)            # keep >=1 valid entry per row

    pool = MaxPooling(dim=-1, keep_dim=False)
    y = jax.block_until_ready(pool(x, mask))
    assert y.shape == (B, H)
    assert jnp.allclose(y, _reference(x, mask, -1, False)), "masked max mismatch"

    y_plain = jax.block_until_ready(pool(x))
    assert jnp.allclose(y_plain, _reference(x, None, -1, False)), "plain max mismatch"

    pool_kd = MaxPooling(dim=-1, keep_dim=True)
    y_kd = jax.block_until_ready(pool_kd(x, mask))
    assert y_kd.shape == (B, H, 1)
    assert jnp.allclose(y_kd, _reference(x, mask, -1, True)), "keep_dim mismatch"

    # 2) Broadcast mask (B, T, 1), non-last pooling dim, and a row tail
    #    (R = 150 is not a multiple of the chosen tile -> exercises clamping).
    B2, T2, D2 = 3, 100, 50
    x2 = jax.random.normal(k3, (B2, T2, D2), dtype=jnp.float32)
    mask2 = (jax.random.uniform(k4, (B2, T2, 1)) > 0.25).astype(jnp.int32)
    mask2 = mask2.at[:, 0, :].set(1)
    pool_seq = MaxPooling(dim=1, keep_dim=False)      # pool over the length axis
    y2 = jax.block_until_ready(pool_seq(x2, mask2))
    assert y2.shape == (B2, D2)
    assert jnp.allclose(y2, _reference(x2, mask2, 1, False)), "broadcast-mask mismatch"

    # 3) Integer dtype (sentinel = iinfo.min instead of -inf).
    xi = jax.random.randint(k1, (2, 16, 32), -50, 50, dtype=jnp.int32)
    maski = (jax.random.uniform(k2, (2, 16, 32)) > 0.5).astype(jnp.int32)
    maski = maski.at[..., 0].set(1)
    yi = jax.block_until_ready(pool(xi, maski))
    assert yi.shape == (2, 16)
    assert jnp.array_equal(yi, _reference(xi, maski, -1, False)), "int max mismatch"

    print("KERNEL_OK")
</pallas_src>

<mosaic_0001>
module attributes {stable_mosaic.version = 11 : i64} {
  func.func @_masked_max_kernel(%arg0: i32, %arg1: memref<8x128xf32, #tpu.memory_space<vmem>>, %arg2: memref<8x128xi32, #tpu.memory_space<vmem>>, %arg3: memref<8x1xf32, #tpu.memory_space<vmem>>) attributes {dimension_semantics = [#tpu.dimension_semantics<parallel>], iteration_bounds = array<i64: 1>, scalar_prefetch = 0 : i64, scratch_operands = 0 : i64, tpu.core_type = #tpu.core_type<tc>, window_params = [{transform_indices = @transform_0, window_bounds = array<i64: 8, 128>}, {transform_indices = @transform_1, window_bounds = array<i64: 8, 128>}, {transform_indices = @transform_2, window_bounds = array<i64: 8, 1>}]} {
    %c0 = arith.constant 0 : index
    %c0_0 = arith.constant 0 : index
    %0 = vector.load %arg1[%c0, %c0_0] : memref<8x128xf32, #tpu.memory_space<vmem>>, vector<8x128xf32>
    %c0_1 = arith.constant 0 : index
    %c0_2 = arith.constant 0 : index
    %1 = vector.load %arg2[%c0_1, %c0_2] : memref<8x128xi32, #tpu.memory_space<vmem>>, vector<8x128xi32>
    %c0_i32 = arith.constant 0 : i32
    %2 = vector.broadcast %c0_i32 : i32 to vector<8x128xi32>
    %3 = arith.cmpi eq, %1, %2 : vector<8x128xi32>
    %cst = arith.constant 0xFF800000 : f32
    %4 = vector.broadcast %cst : f32 to vector<8x128xf32>
    %5 = arith.select %3, %4, %0 : vector<8x128xi1>, vector<8x128xf32>
    %cst_3 = arith.constant dense<0xFF800000> : vector<8xf32>
    %6 = vector.multi_reduction <maximumf>, %5, %cst_3 [1] : vector<8x128xf32> to vector<8xf32>
    %7 = vector.shape_cast %6 : vector<8xf32> to vector<8x1xf32>
    %c0_4 = arith.constant 0 : index
    %c0_5 = arith.constant 0 : index
    %8 = vector.load %arg3[%c0_4, %c0_5] : memref<8x1xf32, #tpu.memory_space<vmem>>, vector<8x1xf32>
    tpu.vector_store %arg3[%c0_4, %c0_5], %7 {strides = array<i32>} : memref<8x1xf32, #tpu.memory_space<vmem>>, vector<8x1xf32>,
    return
  }
  func.func @transform_0(%arg0: i32) -> (i32, i32) {
    %c0_i32 = arith.constant 0 : i32
    %c0_i32_0 = arith.constant 0 : i32
    return %arg0, %c0_i32 : i32, i32
  }
  func.func @transform_1(%arg0: i32) -> (i32, i32) {
    %c0_i32 = arith.constant 0 : i32
    %c0_i32_0 = arith.constant 0 : i32
    return %arg0, %c0_i32 : i32, i32
  }
  func.func @transform_2(%arg0: i32) -> (i32, i32) {
    %c0_i32 = arith.constant 0 : i32
    %c0_i32_0 = arith.constant 0 : i32
    return %arg0, %c0_i32 : i32, i32
  }
}

</mosaic_0001>

<bundles_post_ra>
// kernel: tpu_custom_call.1
= control target key start
LH: loop header
LB: loop body
LE: loop exit
PB: predicated region body
PF: predicated region fallthrough
CT: control target
= control target key end

     0   :  { %7 = vsyncpa [#allocation3], 0  ;;  %s143_s0 = inlined_call_operand.hbm [shape: f32[8,128], index: 0, kind: input, shape index: {}]   ;;  %s144_s1 = inlined_call_operand.hbm [shape: s32[8,128], index: 1, kind: input, shape index: {}]   ;;  %s145_s2 = inlined_call_operand.vmem [shape: f32[8,1], index: 2, kind: output, shape index: {}]  }
   0x1   :  { %8 = vsyncpa [#allocation5], 0  ;;  %s99_s9 = smov [#allocation2]   ;;  %s100_s11 = smov [#allocation4]  }
   0x2   :  { %s15_s10 = sshll.u32 %s99_s9, 4  ;;  %s25_s12 = sshll.u32 %s100_s11, 4  ;;  %s16_s10 = int_to_ptr.vmem [resolvable:$true] %s15_s10  ;;  %s26_s12 = int_to_ptr.vmem [resolvable:$true] %s25_s12 }
   0x3   :  { %s51_s15 = scalar_lea.hbm %s143_s0, 128 }
   0x4   :  { %p52_p0 = scmp.ne.s32.totalorder %s143_s0, %s51_s15  ;;  %p55_p1 = scmp.lt.u32.totalorder %s51_s15, %s143_s0 }
   0x6   :  { %p57_p2 = pnand %p55_p1, %p52_p0 }
   0x8   :  { %60 = shalt.err (!%p57_p2)
}
   0x9   :  { %s61_s20 = scalar_lea.vmem %s16_s10, 128  ;;  %p66_p4 = scmp.lt.s32.totalorder %s16_s10, %s16_s10 }
   0xa   :  { %p62_p3 = scmp.ne.s32.totalorder %s16_s10, %s61_s20  ;;  %p67_p5 = scmp.lt.s32.totalorder %s61_s20, %s61_s20 }
   0xc   :  { %p68_p6 = por %p67_p5, %p66_p4 }
   0xe   :  { %p69_p7 = pnand %p68_p6, %p62_p3 }
  0x10   :  { %72 = shalt.err (!%p69_p7)
}
  0x11   :  { %18 = dma.hbm_to_vmem [thread:$0]  %s143_s0, 128, %s16_s10, [#allocation3]  }
  0x12   :  { %s73_s25 = scalar_lea.hbm %s144_s1, 128 }
  0x13   :  { %p74_p8 = scmp.ne.s32.totalorder %s144_s1, %s73_s25  ;;  %p77_p9 = scmp.lt.u32.totalorder %s73_s25, %s144_s1 }
  0x15   :  { %p79_p10 = pnand %p77_p9, %p74_p8 }
  0x17   :  { %82 = shalt.err (!%p79_p10)
}
  0x18   :  { %s83_s30 = scalar_lea.vmem %s26_s12, 128  ;;  %p88_p12 = scmp.lt.s32.totalorder %s26_s12, %s26_s12 }
  0x19   :  { %p84_p11 = scmp.ne.s32.totalorder %s26_s12, %s83_s30  ;;  %p89_p13 = scmp.lt.s32.totalorder %s83_s30, %s83_s30 }
  0x1b   :  { %p90_p0 = por %p89_p13, %p88_p12 }
  0x1d   :  { %p91_p1 = pnand %p90_p0, %p84_p11 }
  0x1f   :  { %94 = shalt.err (!%p91_p1)
}
  0x20   :  { %28 = dma.hbm_to_vmem [thread:$0]  %s144_s1, 128, %s26_s12, [#allocation5]  }
  0x21   :  { %95 = dma.done.wait [#allocation3], 128  }
  0x22   :  { %96 = vsyncadd [#allocation3], 4294967168 }
  0x23   :  { %97 = dma.done.wait [#allocation5], 128  }
  0x24   :  { %98 = vsyncadd [#allocation5], 4294967168  ;;  %v35_v0 = vld [vmem:[#allocation2] sm:$0xff]  ;;  %v36_v1 = vld [vmem:[#allocation4] sm:$0xff]  ;;  %vm41_vm1 = vcmask 7168  }
  0x25   :  { %vm37_vm0 = vcmp.eq.s32.totalorder %v36_v1, 0 }
  0x26   :  { %v38_v2 = vsel %vm37_vm0, -inf, %v35_v0 }
  0x27   :  { %39 = vmax.xlane.f32.xlu0 %v38_v2 }
  0xb4   :  { %v40_v3 = vpop.xlane.xlu0 %39 }
  0xb5   :  { %42 = vst.msk [vmem:[%s145_s2] sm:$0xff] %vm41_vm1, %v40_v3 }
  0xb6   :  { %47 = vsyncpa [#allocation3], 1 }
  0xb7   :  { %48 = vsyncpa [#allocation5], 1 }

</bundles_post_ra>
